<compile_context>
chip_gen: v7x
topology: tpu7x:2x2x1
jax: 0.10.0
libtpu: 0.0.40
codegen_flags: <defaults>
</compile_context>

<pallas_src>
import functools

import jax
import jax.numpy as jnp
from jax.experimental import pallas as pl
from jax.experimental.pallas import tpu as pltpu

LANE = 128


def _round_up(x, m):
    return ((x + m - 1) // m) * m


def _pad_to(a, shape):
    return jnp.pad(a, [(0, s - d) for d, s in zip(a.shape, shape)])


# -----------------------------------------------------------------------------
# Fused Pallas kernel: all TemporalBlocks + Linear head, one batch element per
# grid step.
# -----------------------------------------------------------------------------
def tcn_fused_kernel(x_ref, w_ref, b_ref, o_ref, buf, *,
                     T, K, Cpad, PAD8, dilations, has_down, out_size):
    """x_ref : (1, T, Cpad) f32   lane-padded input (one batch element)
    w_ref : (W_ROWS, Cpad) bf16   packed weight slab (conv taps / 1x1 / linear)
    b_ref : (NB8, Cpad)    f32    packed bias slab
    o_ref : (1, T, out_size) f32  narrow output
    buf   : (PAD8 + T, Cpad) f32  VMEM scratch for causal left-padding
    """
    # Zero the causal-pad rows (they are never overwritten: activation writes
    # always start at the sublane-aligned offset PAD8).
    if PAD8 > 0:
        buf[0:PAD8, :] = jnp.zeros((PAD8, Cpad), jnp.float32)

    def causal_conv(w_base, b_idx, dil):
        """Causal dilated conv as K accumulating bf16 dots (no im2col concat)."""
        pad = (K - 1) * dil                       # static, pad <= PAD8
        acc = jnp.zeros((T, Cpad), jnp.float32)
        for k in range(K):
            s = PAD8 - pad + k * dil              # static slice start, >= 0
            tap = buf[s:s + T, :].astype(jnp.bfloat16)
            wk = w_ref[w_base + k * Cpad: w_base + (k + 1) * Cpad, :]
            acc = acc + jnp.dot(tap, wk, preferred_element_type=jnp.float32)
        return acc + b_ref[b_idx:b_idx + 1, :]

    h = x_ref[0].astype(jnp.float32)              # (T, Cpad) f32

    wi = 0   # static row offset into the weight slab
    bi = 0   # static row offset into the bias slab
    for dil, hd in zip(dilations, has_down):
        # conv1 (causal, dilated) -> ReLU    (dropout1 = identity at inference)
        buf[PAD8:PAD8 + T, :] = h                 # sublane-aligned store
        h1 = jnp.maximum(causal_conv(wi, bi, dil), 0.0)
        wi += K * Cpad
        bi += 1
        # conv2 (causal, dilated) -> ReLU    (dropout2 = identity at inference)
        buf[PAD8:PAD8 + T, :] = h1
        h2 = jnp.maximum(causal_conv(wi, bi, dil), 0.0)
        wi += K * Cpad
        bi += 1
        # residual (+ optional 1x1 downsample) -> ReLU   (all in f32)
        if hd:
            wd = w_ref[wi:wi + Cpad, :]
            res = jnp.dot(h.astype(jnp.bfloat16), wd,
                          preferred_element_type=jnp.float32) + b_ref[bi:bi + 1, :]
            wi += Cpad
            bi += 1
        else:
            res = h
        h = jnp.maximum(h2 + res, 0.0)

    # Final Linear head; emit only the valid output lanes (masked store, but
    # saves ~32x output HBM bytes + the XLA slice round trip).
    lw = w_ref[wi:wi + Cpad, :]
    out = jnp.dot(h.astype(jnp.bfloat16), lw,
                  preferred_element_type=jnp.float32) + b_ref[bi:bi + 1, :]
    o_ref[0] = out[:, :out_size]


# -----------------------------------------------------------------------------
# Host-side parameter packing: lane-pad to 128, flatten conv taps, concatenate
# everything into one bf16 weight slab + one f32 bias slab.
# -----------------------------------------------------------------------------
def prepare_packed_params(params, kernel_size, Cpad=LANE):
    K = kernel_size
    w_rows, b_rows, dilations, has_down = [], [], [], []
    for i, blk in enumerate(params["blocks"]):
        dilations.append(2 ** i)
        cin, cout = blk["w1"].shape[1], blk["w1"].shape[2]
        assert cin <= Cpad and cout <= Cpad, \
            "channel counts must be <= 128; tile channels instead of lane-padding"
        w_rows.append(_pad_to(blk["w1"], (K, Cpad, Cpad)).reshape(K * Cpad, Cpad))
        b_rows.append(_pad_to(blk["b1"], (1, Cpad)))
        w_rows.append(_pad_to(blk["w2"], (K, Cpad, Cpad)).reshape(K * Cpad, Cpad))
        b_rows.append(_pad_to(blk["b2"], (1, Cpad)))
        hd = "wd" in blk
        has_down.append(hd)
        if hd:
            w_rows.append(_pad_to(blk["wd"], (Cpad, Cpad)))
            b_rows.append(_pad_to(blk["bd"], (1, Cpad)))
    w_rows.append(_pad_to(params["lin_w"], (Cpad, Cpad)))
    b_rows.append(_pad_to(params["lin_b"], (1, Cpad)))

    w_slab = jnp.concatenate(w_rows, axis=0).astype(jnp.bfloat16)
    b_slab = jnp.concatenate(b_rows, axis=0).astype(jnp.float32)
    nb8 = _round_up(b_slab.shape[0], 8)           # sublane-align the bias slab
    if nb8 != b_slab.shape[0]:
        b_slab = jnp.pad(b_slab, ((0, nb8 - b_slab.shape[0]), (0, 0)))
    return w_slab, b_slab, tuple(dilations), tuple(has_down)


# -----------------------------------------------------------------------------
# Wrapper
# -----------------------------------------------------------------------------
def tcn_forward(x, params, kernel_size):
    """x: (B, seq_len, input_size, input_channels) -> (B, seq_len, output_size, 1)"""
    B, T, S, C = x.shape
    cin0 = S * C
    Cpad = LANE
    out_size = params["lin_w"].shape[-1]
    assert cin0 <= Cpad and out_size <= Cpad
    # TODO(synk): for long sequences, tile the time axis (carrying a causal halo
    # of (K-1)*sum(dilations) rows per layer) and choose >=256 rows per dot so
    # the MXU M-dimension is saturated; at these toy sizes batch-gridding with
    # everything resident in VMEM is latency-optimal.

    h = x.reshape(B, T, cin0).astype(jnp.float32)          # NWC, time-major
    xp = jnp.pad(h, ((0, 0), (0, 0), (0, Cpad - cin0)))    # lane-pad channels

    w_slab, b_slab, dilations, has_down = prepare_packed_params(
        params, kernel_size, Cpad)
    max_pad = (kernel_size - 1) * max(dilations)
    PAD8 = _round_up(max_pad, 8)        # sublane-aligned causal-pad region

    kernel = functools.partial(
        tcn_fused_kernel, T=T, K=kernel_size, Cpad=Cpad, PAD8=PAD8,
        dilations=dilations, has_down=has_down, out_size=out_size)

    # TODO(synk): weight/bias specs could use pipeline_mode=pl.Buffered(1) to
    # drop their second VMEM buffer once shapes approach the v7x 64 MiB budget.
    out = pl.pallas_call(
        kernel,
        out_shape=jax.ShapeDtypeStruct((B, T, out_size), jnp.float32),
        grid=(B,),
        in_specs=[
            pl.BlockSpec((1, T, Cpad), lambda b: (b, 0, 0)),
            pl.BlockSpec(w_slab.shape, lambda b: (0, 0)),   # fetched once
            pl.BlockSpec(b_slab.shape, lambda b: (0, 0)),   # fetched once
        ],
        out_specs=pl.BlockSpec((1, T, out_size), lambda b: (b, 0, 0)),
        scratch_shapes=[pltpu.VMEM((PAD8 + T, Cpad), jnp.float32)],
        compiler_params=pltpu.CompilerParams(
            dimension_semantics=("parallel",),      # shards over v7x's 2 TCs
            vmem_limit_bytes=32 * 1024 * 1024),     # explicit (v5e default 16MiB)
    )(xp, w_slab, b_slab)

    return out[..., None]                           # unsqueeze(-1)


# -----------------------------------------------------------------------------
# Deterministic parameter init (shapes follow the PyTorch module)
# -----------------------------------------------------------------------------
def init_params(key, cin0, num_channels, kernel_size, output_size):
    blocks = []
    cin = cin0
    for cout in num_channels:
        key, k0, k1, k2, k3, k4, k5 = jax.random.split(key, 7)
        blk = {
            "w1": 0.1 * jax.random.normal(k0, (kernel_size, cin, cout), jnp.float32),
            "b1": 0.1 * jax.random.normal(k1, (1, cout), jnp.float32),
            "w2": 0.1 * jax.random.normal(k2, (kernel_size, cout, cout), jnp.float32),
            "b2": 0.1 * jax.random.normal(k3, (1, cout), jnp.float32),
        }
        if cin != cout:   # 1x1 downsample conv only when channel counts differ
            blk["wd"] = 0.1 * jax.random.normal(k4, (cin, cout), jnp.float32)
            blk["bd"] = 0.1 * jax.random.normal(k5, (1, cout), jnp.float32)
        blocks.append(blk)
        cin = cout
    key, ka, kb = jax.random.split(key, 3)
    return {
        "blocks": blocks,
        "lin_w": 0.1 * jax.random.normal(ka, (cin, output_size), jnp.float32),
        "lin_b": 0.1 * jax.random.normal(kb, (1, output_size), jnp.float32),
    }


# -----------------------------------------------------------------------------
# Pure-JAX f32 reference for correctness check
# -----------------------------------------------------------------------------
def _ref_causal_conv(x, w, b, dilation):
    B, T, _ = x.shape
    K = w.shape[0]
    pad = (K - 1) * dilation
    xp = jnp.pad(x, ((0, 0), (pad, 0), (0, 0)))
    acc = jnp.zeros((B, T, w.shape[-1]), jnp.float32)
    for k in range(K):
        acc = acc + jnp.einsum("btc,cd->btd",
                               xp[:, k * dilation:k * dilation + T, :], w[k])
    return acc + b[None]


def ref_forward(x, params, kernel_size):
    B, T, S, C = x.shape
    h = x.reshape(B, T, S * C).astype(jnp.float32)
    for i, blk in enumerate(params["blocks"]):
        d = 2 ** i
        h1 = jax.nn.relu(_ref_causal_conv(h, blk["w1"], blk["b1"], d))
        h2 = jax.nn.relu(_ref_causal_conv(h1, blk["w2"], blk["b2"], d))
        if "wd" in blk:
            res = jnp.einsum("btc,cd->btd", h, blk["wd"]) + blk["bd"][None]
        else:
            res = h
        h = jax.nn.relu(h2 + res)
    out = jnp.einsum("btc,cd->btd", h, params["lin_w"]) + params["lin_b"][None]
    return out[..., None]


# -----------------------------------------------------------------------------
if __name__ == "__main__":
    # Module hyper-params (small, consistent with the forward pass)
    batch, seq_len = 2, 16
    input_size, input_channels = 4, 2          # -> TCN input channels = 8
    num_channels = [16, 16]
    kernel_size = 3
    output_size = 4
    # dropout / horizon do not affect the (eval) forward pass

    key = jax.random.PRNGKey(0)
    kx, kp = jax.random.split(key)
    x = jax.random.normal(kx, (batch, seq_len, input_size, input_channels),
                          jnp.float32)
    params = init_params(kp, input_size * input_channels, num_channels,
                         kernel_size, output_size)

    out = tcn_forward(x, params, kernel_size)
    out = jax.block_until_ready(out)

    assert out.shape == (batch, seq_len, output_size, 1), out.shape

    ref = jax.block_until_ready(ref_forward(x, params, kernel_size))
    # bf16 MXU with f32 accumulation vs pure-f32 reference -> relaxed tolerance.
    assert jnp.allclose(out, ref, rtol=2e-2, atol=2e-2), \
        float(jnp.max(jnp.abs(out - ref)))

    print("KERNEL_OK")
</pallas_src>

<mosaic_0001>
module attributes {stable_mosaic.version = 11 : i64} {
  func.func @tcn_fused_kernel(%arg0: i32, %arg1: memref<1x16x128xf32, #tpu.memory_space<vmem>>, %arg2: memref<1792x128xbf16, #tpu.memory_space<vmem>>, %arg3: memref<8x128xf32, #tpu.memory_space<vmem>>, %arg4: memref<1x16x4xf32, #tpu.memory_space<vmem>>, %arg5: memref<24x128xf32, #tpu.memory_space<vmem>>) attributes {dimension_semantics = [#tpu.dimension_semantics<parallel>], iteration_bounds = array<i64: 2>, scalar_prefetch = 0 : i64, scratch_operands = 1 : i64, tpu.core_type = #tpu.core_type<tc>, window_params = [{transform_indices = @transform_0, window_bounds = array<i64: 1, 16, 128>}, {pipeline_mode = #tpu.pipeline_mode<synchronous>, transform_indices = @transform_1, window_bounds = array<i64: 1792, 128>}, {pipeline_mode = #tpu.pipeline_mode<synchronous>, transform_indices = @transform_2, window_bounds = array<i64: 8, 128>}, {transform_indices = @transform_3, window_bounds = array<i64: 1, 16, 4>}]} {
    %cst = arith.constant 0.000000e+00 : f32
    %0 = vector.broadcast %cst : f32 to vector<8x128xf32>
    %c0 = arith.constant 0 : index
    %c0_0 = arith.constant 0 : index
    %1 = vector.load %arg5[%c0, %c0_0] : memref<24x128xf32, #tpu.memory_space<vmem>>, vector<8x128xf32>
    tpu.vector_store %arg5[%c0, %c0_0], %0 {strides = array<i32>} : memref<24x128xf32, #tpu.memory_space<vmem>>, vector<8x128xf32>,
    %c0_1 = arith.constant 0 : index
    %c0_2 = arith.constant 0 : index
    %c0_3 = arith.constant 0 : index
    %2 = vector.load %arg1[%c0_1, %c0_2, %c0_3] : memref<1x16x128xf32, #tpu.memory_space<vmem>>, vector<1x16x128xf32>
    %3 = vector.shape_cast %2 : vector<1x16x128xf32> to vector<16x128xf32>
    %c8 = arith.constant 8 : index
    %c0_4 = arith.constant 0 : index
    %4 = vector.load %arg5[%c8, %c0_4] : memref<24x128xf32, #tpu.memory_space<vmem>>, vector<16x128xf32>
    tpu.vector_store %arg5[%c8, %c0_4], %3 {strides = array<i32>} : memref<24x128xf32, #tpu.memory_space<vmem>>, vector<16x128xf32>,
    %cst_5 = arith.constant 0.000000e+00 : f32
    %5 = vector.broadcast %cst_5 : f32 to vector<16x128xf32>
    %c6 = arith.constant 6 : index
    %c0_6 = arith.constant 0 : index
    %6 = vector.load %arg5[%c6, %c0_6] : memref<24x128xf32, #tpu.memory_space<vmem>>, vector<16x128xf32>
    %7 = arith.truncf %6 : vector<16x128xf32> to vector<16x128xbf16>
    %c0_7 = arith.constant 0 : index
    %c0_8 = arith.constant 0 : index
    %8 = vector.load %arg2[%c0_7, %c0_8] : memref<1792x128xbf16, #tpu.memory_space<vmem>>, vector<128x128xbf16>
    %cst_9 = arith.constant dense<0.000000e+00> : vector<16x128xf32>
    %9 = tpu.matmul %7, %8, %cst_9 {dimension_numbers = #tpu.dot_dimension_numbers<[1], [0], [0], [1], [0, 0, 1, 1], [], []>} : vector<16x128xbf16>, vector<128x128xbf16>, vector<16x128xf32> -> vector<16x128xf32>
    %10 = arith.addf %5, %9 : vector<16x128xf32>
    %c7 = arith.constant 7 : index
    %c0_10 = arith.constant 0 : index
    %11 = vector.load %arg5[%c7, %c0_10] : memref<24x128xf32, #tpu.memory_space<vmem>>, vector<16x128xf32>
    %12 = arith.truncf %11 : vector<16x128xf32> to vector<16x128xbf16>
    %c128 = arith.constant 128 : index
    %c0_11 = arith.constant 0 : index
    %13 = vector.load %arg2[%c128, %c0_11] : memref<1792x128xbf16, #tpu.memory_space<vmem>>, vector<128x128xbf16>
    %cst_12 = arith.constant dense<0.000000e+00> : vector<16x128xf32>
    %14 = tpu.matmul %12, %13, %cst_12 {dimension_numbers = #tpu.dot_dimension_numbers<[1], [0], [0], [1], [0, 0, 1, 1], [], []>} : vector<16x128xbf16>, vector<128x128xbf16>, vector<16x128xf32> -> vector<16x128xf32>
    %15 = arith.addf %10, %14 : vector<16x128xf32>
    %c8_13 = arith.constant 8 : index
    %c0_14 = arith.constant 0 : index
    %16 = vector.load %arg5[%c8_13, %c0_14] : memref<24x128xf32, #tpu.memory_space<vmem>>, vector<16x128xf32>
    %17 = arith.truncf %16 : vector<16x128xf32> to vector<16x128xbf16>
    %c256 = arith.constant 256 : index
    %c0_15 = arith.constant 0 : index
    %18 = vector.load %arg2[%c256, %c0_15] : memref<1792x128xbf16, #tpu.memory_space<vmem>>, vector<128x128xbf16>
    %cst_16 = arith.constant dense<0.000000e+00> : vector<16x128xf32>
    %19 = tpu.matmul %17, %18, %cst_16 {dimension_numbers = #tpu.dot_dimension_numbers<[1], [0], [0], [1], [0, 0, 1, 1], [], []>} : vector<16x128xbf16>, vector<128x128xbf16>, vector<16x128xf32> -> vector<16x128xf32>
    %20 = arith.addf %15, %19 : vector<16x128xf32>
    %c0_17 = arith.constant 0 : index
    %c0_18 = arith.constant 0 : index
    %21 = vector.load %arg3[%c0_17, %c0_18] : memref<8x128xf32, #tpu.memory_space<vmem>>, vector<1x128xf32>
    %22 = vector.broadcast %21 : vector<1x128xf32> to vector<16x128xf32>
    %23 = arith.addf %20, %22 : vector<16x128xf32>
    %cst_19 = arith.constant 0.000000e+00 : f32
    %24 = vector.broadcast %cst_19 : f32 to vector<16x128xf32>
    %25 = arith.maximumf %23, %24 : vector<16x128xf32>
    %c8_20 = arith.constant 8 : index
    %c0_21 = arith.constant 0 : index
    %26 = vector.load %arg5[%c8_20, %c0_21] : memref<24x128xf32, #tpu.memory_space<vmem>>, vector<16x128xf32>
    tpu.vector_store %arg5[%c8_20, %c0_21], %25 {strides = array<i32>} : memref<24x128xf32, #tpu.memory_space<vmem>>, vector<16x128xf32>,
    %cst_22 = arith.constant 0.000000e+00 : f32
    %27 = vector.broadcast %cst_22 : f32 to vector<16x128xf32>
    %c6_23 = arith.constant 6 : index
    %c0_24 = arith.constant 0 : index
    %28 = vector.load %arg5[%c6_23, %c0_24] : memref<24x128xf32, #tpu.memory_space<vmem>>, vector<16x128xf32>
    %29 = arith.truncf %28 : vector<16x128xf32> to vector<16x128xbf16>
    %c384 = arith.constant 384 : index
    %c0_25 = arith.constant 0 : index
    %30 = vector.load %arg2[%c384, %c0_25] : memref<1792x128xbf16, #tpu.memory_space<vmem>>, vector<128x128xbf16>
    %cst_26 = arith.constant dense<0.000000e+00> : vector<16x128xf32>
    %31 = tpu.matmul %29, %30, %cst_26 {dimension_numbers = #tpu.dot_dimension_numbers<[1], [0], [0], [1], [0, 0, 1, 1], [], []>} : vector<16x128xbf16>, vector<128x128xbf16>, vector<16x128xf32> -> vector<16x128xf32>
    %32 = arith.addf %27, %31 : vector<16x128xf32>
    %c7_27 = arith.constant 7 : index
    %c0_28 = arith.constant 0 : index
    %33 = vector.load %arg5[%c7_27, %c0_28] : memref<24x128xf32, #tpu.memory_space<vmem>>, vector<16x128xf32>
    %34 = arith.truncf %33 : vector<16x128xf32> to vector<16x128xbf16>
    %c512 = arith.constant 512 : index
    %c0_29 = arith.constant 0 : index
    %35 = vector.load %arg2[%c512, %c0_29] : memref<1792x128xbf16, #tpu.memory_space<vmem>>, vector<128x128xbf16>
    %cst_30 = arith.constant dense<0.000000e+00> : vector<16x128xf32>
    %36 = tpu.matmul %34, %35, %cst_30 {dimension_numbers = #tpu.dot_dimension_numbers<[1], [0], [0], [1], [0, 0, 1, 1], [], []>} : vector<16x128xbf16>, vector<128x128xbf16>, vector<16x128xf32> -> vector<16x128xf32>
    %37 = arith.addf %32, %36 : vector<16x128xf32>
    %c8_31 = arith.constant 8 : index
    %c0_32 = arith.constant 0 : index
    %38 = vector.load %arg5[%c8_31, %c0_32] : memref<24x128xf32, #tpu.memory_space<vmem>>, vector<16x128xf32>
    %39 = arith.truncf %38 : vector<16x128xf32> to vector<16x128xbf16>
    %c640 = arith.constant 640 : index
    %c0_33 = arith.constant 0 : index
    %40 = vector.load %arg2[%c640, %c0_33] : memref<1792x128xbf16, #tpu.memory_space<vmem>>, vector<128x128xbf16>
    %cst_34 = arith.constant dense<0.000000e+00> : vector<16x128xf32>
    %41 = tpu.matmul %39, %40, %cst_34 {dimension_numbers = #tpu.dot_dimension_numbers<[1], [0], [0], [1], [0, 0, 1, 1], [], []>} : vector<16x128xbf16>, vector<128x128xbf16>, vector<16x128xf32> -> vector<16x128xf32>
    %42 = arith.addf %37, %41 : vector<16x128xf32>
    %c1 = arith.constant 1 : index
    %c0_35 = arith.constant 0 : index
    %43 = vector.load %arg3[%c1, %c0_35] : memref<8x128xf32, #tpu.memory_space<vmem>>, vector<1x128xf32>
    %44 = vector.broadcast %43 : vector<1x128xf32> to vector<16x128xf32>
    %45 = arith.addf %42, %44 : vector<16x128xf32>
    %cst_36 = arith.constant 0.000000e+00 : f32
    %46 = vector.broadcast %cst_36 : f32 to vector<16x128xf32>
    %47 = arith.maximumf %45, %46 : vector<16x128xf32>
    %c768 = arith.constant 768 : index
    %c0_37 = arith.constant 0 : index
    %48 = vector.load %arg2[%c768, %c0_37] : memref<1792x128xbf16, #tpu.memory_space<vmem>>, vector<128x128xbf16>
    %49 = arith.truncf %3 : vector<16x128xf32> to vector<16x128xbf16>
    %cst_38 = arith.constant dense<0.000000e+00> : vector<16x128xf32>
    %50 = tpu.matmul %49, %48, %cst_38 {dimension_numbers = #tpu.dot_dimension_numbers<[1], [0], [0], [1], [0, 0, 1, 1], [], []>} : vector<16x128xbf16>, vector<128x128xbf16>, vector<16x128xf32> -> vector<16x128xf32>
    %c2 = arith.constant 2 : index
    %c0_39 = arith.constant 0 : index
    %51 = vector.load %arg3[%c2, %c0_39] : memref<8x128xf32, #tpu.memory_space<vmem>>, vector<1x128xf32>
    %52 = vector.broadcast %51 : vector<1x128xf32> to vector<16x128xf32>
    %53 = arith.addf %50, %52 : vector<16x128xf32>
    %54 = arith.addf %47, %53 : vector<16x128xf32>
    %cst_40 = arith.constant 0.000000e+00 : f32
    %55 = vector.broadcast %cst_40 : f32 to vector<16x128xf32>
    %56 = arith.maximumf %54, %55 : vector<16x128xf32>
    %c8_41 = arith.constant 8 : index
    %c0_42 = arith.constant 0 : index
    %57 = vector.load %arg5[%c8_41, %c0_42] : memref<24x128xf32, #tpu.memory_space<vmem>>, vector<16x128xf32>
    tpu.vector_store %arg5[%c8_41, %c0_42], %56 {strides = array<i32>} : memref<24x128xf32, #tpu.memory_space<vmem>>, vector<16x128xf32>,
    %cst_43 = arith.constant 0.000000e+00 : f32
    %58 = vector.broadcast %cst_43 : f32 to vector<16x128xf32>
    %c4 = arith.constant 4 : index
    %c0_44 = arith.constant 0 : index
    %59 = vector.load %arg5[%c4, %c0_44] : memref<24x128xf32, #tpu.memory_space<vmem>>, vector<16x128xf32>
    %60 = arith.truncf %59 : vector<16x128xf32> to vector<16x128xbf16>
    %c896 = arith.constant 896 : index
    %c0_45 = arith.constant 0 : index
    %61 = vector.load %arg2[%c896, %c0_45] : memref<1792x128xbf16, #tpu.memory_space<vmem>>, vector<128x128xbf16>
    %cst_46 = arith.constant dense<0.000000e+00> : vector<16x128xf32>
    %62 = tpu.matmul %60, %61, %cst_46 {dimension_numbers = #tpu.dot_dimension_numbers<[1], [0], [0], [1], [0, 0, 1, 1], [], []>} : vector<16x128xbf16>, vector<128x128xbf16>, vector<16x128xf32> -> vector<16x128xf32>
    %63 = arith.addf %58, %62 : vector<16x128xf32>
    %c6_47 = arith.constant 6 : index
    %c0_48 = arith.constant 0 : index
    %64 = vector.load %arg5[%c6_47, %c0_48] : memref<24x128xf32, #tpu.memory_space<vmem>>, vector<16x128xf32>
    %65 = arith.truncf %64 : vector<16x128xf32> to vector<16x128xbf16>
    %c1024 = arith.constant 1024 : index
    %c0_49 = arith.constant 0 : index
    %66 = vector.load %arg2[%c1024, %c0_49] : memref<1792x128xbf16, #tpu.memory_space<vmem>>, vector<128x128xbf16>
    %cst_50 = arith.constant dense<0.000000e+00> : vector<16x128xf32>
    %67 = tpu.matmul %65, %66, %cst_50 {dimension_numbers = #tpu.dot_dimension_numbers<[1], [0], [0], [1], [0, 0, 1, 1], [], []>} : vector<16x128xbf16>, vector<128x128xbf16>, vector<16x128xf32> -> vector<16x128xf32>
    %68 = arith.addf %63, %67 : vector<16x128xf32>
    %c8_51 = arith.constant 8 : index
    %c0_52 = arith.constant 0 : index
    %69 = vector.load %arg5[%c8_51, %c0_52] : memref<24x128xf32, #tpu.memory_space<vmem>>, vector<16x128xf32>
    %70 = arith.truncf %69 : vector<16x128xf32> to vector<16x128xbf16>
    %c1152 = arith.constant 1152 : index
    %c0_53 = arith.constant 0 : index
    %71 = vector.load %arg2[%c1152, %c0_53] : memref<1792x128xbf16, #tpu.memory_space<vmem>>, vector<128x128xbf16>
    %cst_54 = arith.constant dense<0.000000e+00> : vector<16x128xf32>
    %72 = tpu.matmul %70, %71, %cst_54 {dimension_numbers = #tpu.dot_dimension_numbers<[1], [0], [0], [1], [0, 0, 1, 1], [], []>} : vector<16x128xbf16>, vector<128x128xbf16>, vector<16x128xf32> -> vector<16x128xf32>
    %73 = arith.addf %68, %72 : vector<16x128xf32>
    %c3 = arith.constant 3 : index
    %c0_55 = arith.constant 0 : index
    %74 = vector.load %arg3[%c3, %c0_55] : memref<8x128xf32, #tpu.memory_space<vmem>>, vector<1x128xf32>
    %75 = vector.broadcast %74 : vector<1x128xf32> to vector<16x128xf32>
    %76 = arith.addf %73, %75 : vector<16x128xf32>
    %cst_56 = arith.constant 0.000000e+00 : f32
    %77 = vector.broadcast %cst_56 : f32 to vector<16x128xf32>
    %78 = arith.maximumf %76, %77 : vector<16x128xf32>
    %c8_57 = arith.constant 8 : index
    %c0_58 = arith.constant 0 : index
    %79 = vector.load %arg5[%c8_57, %c0_58] : memref<24x128xf32, #tpu.memory_space<vmem>>, vector<16x128xf32>
    tpu.vector_store %arg5[%c8_57, %c0_58], %78 {strides = array<i32>} : memref<24x128xf32, #tpu.memory_space<vmem>>, vector<16x128xf32>,
    %cst_59 = arith.constant 0.000000e+00 : f32
    %80 = vector.broadcast %cst_59 : f32 to vector<16x128xf32>
    %c4_60 = arith.constant 4 : index
    %c0_61 = arith.constant 0 : index
    %81 = vector.load %arg5[%c4_60, %c0_61] : memref<24x128xf32, #tpu.memory_space<vmem>>, vector<16x128xf32>
    %82 = arith.truncf %81 : vector<16x128xf32> to vector<16x128xbf16>
    %c1280 = arith.constant 1280 : index
    %c0_62 = arith.constant 0 : index
    %83 = vector.load %arg2[%c1280, %c0_62] : memref<1792x128xbf16, #tpu.memory_space<vmem>>, vector<128x128xbf16>
    %cst_63 = arith.constant dense<0.000000e+00> : vector<16x128xf32>
    %84 = tpu.matmul %82, %83, %cst_63 {dimension_numbers = #tpu.dot_dimension_numbers<[1], [0], [0], [1], [0, 0, 1, 1], [], []>} : vector<16x128xbf16>, vector<128x128xbf16>, vector<16x128xf32> -> vector<16x128xf32>
    %85 = arith.addf %80, %84 : vector<16x128xf32>
    %c6_64 = arith.constant 6 : index
    %c0_65 = arith.constant 0 : index
    %86 = vector.load %arg5[%c6_64, %c0_65] : memref<24x128xf32, #tpu.memory_space<vmem>>, vector<16x128xf32>
    %87 = arith.truncf %86 : vector<16x128xf32> to vector<16x128xbf16>
    %c1408 = arith.constant 1408 : index
    %c0_66 = arith.constant 0 : index
    %88 = vector.load %arg2[%c1408, %c0_66] : memref<1792x128xbf16, #tpu.memory_space<vmem>>, vector<128x128xbf16>
    %cst_67 = arith.constant dense<0.000000e+00> : vector<16x128xf32>
    %89 = tpu.matmul %87, %88, %cst_67 {dimension_numbers = #tpu.dot_dimension_numbers<[1], [0], [0], [1], [0, 0, 1, 1], [], []>} : vector<16x128xbf16>, vector<128x128xbf16>, vector<16x128xf32> -> vector<16x128xf32>
    %90 = arith.addf %85, %89 : vector<16x128xf32>
    %c8_68 = arith.constant 8 : index
    %c0_69 = arith.constant 0 : index
    %91 = vector.load %arg5[%c8_68, %c0_69] : memref<24x128xf32, #tpu.memory_space<vmem>>, vector<16x128xf32>
    %92 = arith.truncf %91 : vector<16x128xf32> to vector<16x128xbf16>
    %c1536 = arith.constant 1536 : index
    %c0_70 = arith.constant 0 : index
    %93 = vector.load %arg2[%c1536, %c0_70] : memref<1792x128xbf16, #tpu.memory_space<vmem>>, vector<128x128xbf16>
    %cst_71 = arith.constant dense<0.000000e+00> : vector<16x128xf32>
    %94 = tpu.matmul %92, %93, %cst_71 {dimension_numbers = #tpu.dot_dimension_numbers<[1], [0], [0], [1], [0, 0, 1, 1], [], []>} : vector<16x128xbf16>, vector<128x128xbf16>, vector<16x128xf32> -> vector<16x128xf32>
    %95 = arith.addf %90, %94 : vector<16x128xf32>
    %c4_72 = arith.constant 4 : index
    %c0_73 = arith.constant 0 : index
    %96 = vector.load %arg3[%c4_72, %c0_73] : memref<8x128xf32, #tpu.memory_space<vmem>>, vector<1x128xf32>
    %97 = vector.broadcast %96 : vector<1x128xf32> to vector<16x128xf32>
    %98 = arith.addf %95, %97 : vector<16x128xf32>
    %cst_74 = arith.constant 0.000000e+00 : f32
    %99 = vector.broadcast %cst_74 : f32 to vector<16x128xf32>
    %100 = arith.maximumf %98, %99 : vector<16x128xf32>
    %101 = arith.addf %100, %56 : vector<16x128xf32>
    %cst_75 = arith.constant 0.000000e+00 : f32
    %102 = vector.broadcast %cst_75 : f32 to vector<16x128xf32>
    %103 = arith.maximumf %101, %102 : vector<16x128xf32>
    %c1664 = arith.constant 1664 : index
    %c0_76 = arith.constant 0 : index
    %104 = vector.load %arg2[%c1664, %c0_76] : memref<1792x128xbf16, #tpu.memory_space<vmem>>, vector<128x128xbf16>
    %105 = arith.truncf %103 : vector<16x128xf32> to vector<16x128xbf16>
    %cst_77 = arith.constant dense<0.000000e+00> : vector<16x128xf32>
    %106 = tpu.matmul %105, %104, %cst_77 {dimension_numbers = #tpu.dot_dimension_numbers<[1], [0], [0], [1], [0, 0, 1, 1], [], []>} : vector<16x128xbf16>, vector<128x128xbf16>, vector<16x128xf32> -> vector<16x128xf32>
    %c5 = arith.constant 5 : index
    %c0_78 = arith.constant 0 : index
    %107 = vector.load %arg3[%c5, %c0_78] : memref<8x128xf32, #tpu.memory_space<vmem>>, vector<1x128xf32>
    %108 = vector.broadcast %107 : vector<1x128xf32> to vector<16x128xf32>
    %109 = arith.addf %106, %108 : vector<16x128xf32>
    %110 = vector.extract_strided_slice %109 {offsets = [0, 0], sizes = [16, 4], strides = [1, 1]} : vector<16x128xf32> to vector<16x4xf32>
    %c0_79 = arith.constant 0 : index
    %c0_80 = arith.constant 0 : index
    %c0_81 = arith.constant 0 : index
    %111 = vector.load %arg4[%c0_79, %c0_80, %c0_81] : memref<1x16x4xf32, #tpu.memory_space<vmem>>, vector<1x16x4xf32>
    %112 = vector.shape_cast %111 : vector<1x16x4xf32> to vector<16x4xf32>
    %113 = vector.shape_cast %110 : vector<16x4xf32> to vector<1x16x4xf32>
    tpu.vector_store %arg4[%c0_79, %c0_80, %c0_81], %113 {strides = array<i32>} : memref<1x16x4xf32, #tpu.memory_space<vmem>>, vector<1x16x4xf32>,
    return
  }
  func.func @transform_0(%arg0: i32) -> (i32, i32, i32) {
    %c0_i32 = arith.constant 0 : i32
    %c0_i32_0 = arith.constant 0 : i32
    %c0_i32_1 = arith.constant 0 : i32
    return %arg0, %c0_i32, %c0_i32_0 : i32, i32, i32
  }
  func.func @transform_1(%arg0: i32) -> (i32, i32) {
    %c0_i32 = arith.constant 0 : i32
    %c0_i32_0 = arith.constant 0 : i32
    %c0_i32_1 = arith.constant 0 : i32
    return %c0_i32, %c0_i32_0 : i32, i32
  }
  func.func @transform_2(%arg0: i32) -> (i32, i32) {
    %c0_i32 = arith.constant 0 : i32
    %c0_i32_0 = arith.constant 0 : i32
    %c0_i32_1 = arith.constant 0 : i32
    return %c0_i32, %c0_i32_0 : i32, i32
  }
  func.func @transform_3(%arg0: i32) -> (i32, i32, i32) {
    %c0_i32 = arith.constant 0 : i32
    %c0_i32_0 = arith.constant 0 : i32
    %c0_i32_1 = arith.constant 0 : i32
    return %arg0, %c0_i32, %c0_i32_0 : i32, i32, i32
  }
}

</mosaic_0001>

<bundles_post_ra>
// kernel: tpu_custom_call.1
= control target key start
LH: loop header
LB: loop body
LE: loop exit
PB: predicated region body
PF: predicated region fallthrough
CT: control target
= control target key end

     0   :  { %8 = vsyncpa [#allocation4], 0  ;;  %s3104_s0 = inlined_call_operand.hbm [shape: f32[2,16,128], index: 0, kind: input, shape index: {}]   ;;  %s3105_s1 = inlined_call_operand.hbm [shape: bf16[1792,128], index: 1, kind: input, shape index: {}]   ;;  %s3106_s2 = inlined_call_operand.hbm [shape: f32[8,128], index: 2, kind: input, shape index: {}]   ;;  %s3107_s3 = inlined_call_operand.vmem [shape: f32[2,16,4], index: 3, kind: output, shape index: {}]  }
   0x1   :  { %10 = vsyncpa [#allocation4 + $0x1], 0 }
   0x2   :  { %11 = vsyncpa [#allocation6], 0  ;;  %s2765_s12 = smov 0   ;;  %s2767_s13 = smov 0  }
   0x3   :  { %s2769_s14 = smov 0   ;;  %s2771_s15 = smov 0  }
   0x4 LB: > { %s2784_s16 = sadd.s32 4294967295, %s2734_s15   ;;  %p37_p0 = scmp.ne.s32.totalorder %s2726_s13, %s2722_s12  ;;  %s2734_s15 = sphi %s2771_s15, %s3122_s15   ;;  %s2730_s14 = sphi %s2769_s14, %s3121_s14   ;;  %s2726_s13 = sphi %s2767_s13, %s3120_s13   ;;  %s2722_s12 = sphi %s2765_s12, %s3119_s12  }
   0x5   : > { %p3108_p1 = scmp.eq.s32.totalorder %s2784_s16, 0  ;;  %p1890_p2 = scmp.ge.s32.totalorder %s2734_s15, 1 }
   0x6   : > { %p116_p3 = scmp.lt.s32.totalorder %s2734_s15, 3  ;;  %s2736_s19 = smov [#allocation5]  }
   0x7   : > { %p2792_p4 = por %p3108_p1, %p37_p0  ;;  %s128_s20 = sshll.u32 %s2736_s19, 4  ;;  %s129_s20 = int_to_ptr.vmem [resolvable:$true] %s128_s20 }
   0x8   : > { %p2796_p5 = pnand %p1890_p2, %p116_p3  ;;  %s2737_s22 = smov [#allocation7]  }
   0x9   : > { %s3111_s17 = scalar_select %p2792_p4, 1, 0 }
   0xa   : > { %s3112_s18 = scalar_select %p2796_p5, 1, 0 }
   0xb   : > { %p2441_p6 = pneg %p2796_p5  ;;  %s142_s23 = sshll.u32 %s2737_s22, 4  ;;  %s2808_s23 = int_to_ptr.vmem [resolvable:$true] %s142_s23 }
   0xc   : > { %s2610_s26 = scalar_lea.hbm %s3105_s1, 14336 }
   0xd   : > { %p2804_p7 = pnand %p2441_p6, %p3108_p1  ;;  %p2611_p8 = scmp.ne.s32.totalorder %s3105_s1, %s2610_s26 }
   0xe   : > { %p2617_p12 = scmp.lt.u32.totalorder %s2610_s26, %s3105_s1 }
   0xf   : > { %p2612_p9 = pneg %p2804_p7 }
  0x11   : > { %p2613_p10 = pnand %p2612_p9, %p2611_p8 }
  0x13   : > { %p2614_p11 = pneg %p2613_p10 }
  0x15   : > { %p2619_p13 = pnand %p2617_p12, %p2614_p11 }
  0x17   : > { %2622 = shalt.err (!%p2619_p13)
}
  0x18   : > { %s2623_s4 = scalar_lea.vmem %s129_s20, 14336  ;;  %p2631_p6 = scmp.lt.s32.totalorder %s129_s20, %s129_s20 }
  0x19   : > { %p2624_p0 = scmp.ne.s32.totalorder %s129_s20, %s2623_s4  ;;  %p2632_p1 = scmp.lt.s32.totalorder %s2623_s4, %s2623_s4 }
  0x1b   : > { %p2626_p2 = pnand %p2624_p0, %p2612_p9  ;;  %p2633_p4 = por %p2632_p1, %p2631_p6 }
  0x1d   : > { %p2627_p3 = pneg %p2626_p2 }
  0x1f   : > { %p2634_p5 = pnand %p2633_p4, %p2627_p3 }
  0x21   : > { %2637 = shalt.err (!%p2634_p5)
}
  0x22   : > { %s2738_s5 = smov 64   ;;  %s2739_s6 = smov 4  }
  0x23   : > { %2444 = dma.hbm_to_vmem [thread:$0]  (!%p2804_p7), %s3105_s1, 14336, %s129_s20, [#allocation6], %s2738_s5, %s2738_s5, %s2739_s6  }
  0x24   : > { %s2638_s11 = scalar_lea.hbm %s3106_s2, 128 }
  0x25   : > { %p2639_p8 = scmp.ne.s32.totalorder %s3106_s2, %s2638_s11  ;;  %p2645_p5 = scmp.lt.u32.totalorder %s2638_s11, %s3106_s2 }
  0x27   : > { %p2641_p1 = pnand %p2639_p8, %p2612_p9 }
  0x29   : > { %p2642_p4 = pneg %p2641_p1 }
  0x2b   : > { %p2647_p10 = pnand %p2645_p5, %p2642_p4 }
  0x2d   : > { %2650 = shalt.err (!%p2647_p10)
}
  0x2e   : > { %s2651_s20 = scalar_lea.vmem %s2808_s23, 128  ;;  %p2659_p0 = scmp.lt.s32.totalorder %s2808_s23, %s2808_s23 }
  0x2f   : > { %p2652_p11 = scmp.ne.s32.totalorder %s2808_s23, %s2651_s20  ;;  %p2660_p2 = scmp.lt.s32.totalorder %s2651_s20, %s2651_s20 }
  0x31   : > { %p2654_p12 = pnand %p2652_p11, %p2612_p9  ;;  %p2661_p3 = por %p2660_p2, %p2659_p0 }
  0x33   : > { %p2655_p13 = pneg %p2654_p12 }
  0x35   : > { %p2662_p6 = pnand %p2661_p3, %p2655_p13 }
  0x37   : > { %2665 = shalt.err (!%p2662_p6)
}
  0x38   : > { %2447 = dma.hbm_to_vmem [thread:$0]  (!%p2804_p7), %s3106_s2, 128, %s2808_s23, [#allocation6]  }
  0x39   : > { %s2858_s27 = sadd.s32 1, %s2734_s15   ;;  %s24_s28 = sadd.s32 1, %s2730_s14 }
  0x3a   : > { %s21_s21 = ssub.s32 %s2734_s15, %s2858_s27  ;;  %p31_p9 = scmp.ne.s32.totalorder %s2730_s14, %s2726_s13 }
  0x3b   : > { %p22_p8 = scmp.eq.s32.totalorder %s21_s21, 0  ;;  %p32_p1 = scmp.eq.s32.totalorder %s2734_s15, 0 }
  0x3c   : > { %p2454_p4 = scmp.lt.s32.totalorder %s2734_s15, 2  ;;  %s153_s29 = sand.u32 1, %s2730_s14  }
  0x3d   : > { %s2869_s30 = scalar_select %p22_p8, %s2730_s14, %s24_s28  }
  0x3e   : > { %p33_p5 = por %p32_p1, %p31_p9  ;;  %s1894_s4 = sshll.u32 %s153_s29, 4 }
  0x3f   : > { %s2023_s5 = sshll.u32 %s2734_s15, 8  ;;  %s157_s23 = scalar_lea.vmem [#allocation3], %s1894_s4 }
  0x40   : > { %s2875_s8 = scalar_lea.hbm %s3104_s0, %s2023_s5  ;;  %s164_s9 = sshll.u32 %s157_s23, 4  ;;  %s2881_s9 = int_to_ptr.vmem [resolvable:$true] %s164_s9 }
  0x41   : > { %p2877_p7 = pnand %p2454_p4, %p33_p5  ;;  %s2883_s15 = scalar_lea.sflag [#allocation4], %s153_s29 }
  0x42   : > { %s2666_s11 = scalar_lea.hbm %s2875_s8, 256  ;;  %s2671_s22 = scalar_lea.hbm %s3104_s0, 512 }
  0x43   : > { %p2667_p10 = scmp.ne.s32.totalorder %s2875_s8, %s2666_s11  ;;  %p2668_p11 = pneg %p2877_p7 }
  0x44   : > { %p2672_p0 = scmp.lt.u32.totalorder %s2875_s8, %s3104_s0  ;;  %p2673_p2 = scmp.lt.u32.totalorder %s2671_s22, %s2666_s11 }
  0x45   : > { %p2669_p12 = pnand %p2668_p11, %p2667_p10  ;;  %p2675_p6 = scmp.lt.u32.totalorder %s2666_s11, %s2875_s8 }
  0x46   : > { %p2674_p3 = por %p2673_p2, %p2672_p0 }
  0x47   : > { %p2670_p13 = pneg %p2669_p12 }
  0x48   : > { %p2676_p9 = por %p2675_p6, %p2674_p3 }
  0x4a   : > { %p2677_p8 = pnand %p2676_p9, %p2670_p13 }
  0x4c   : > { %2680 = shalt.err (!%p2677_p8)
}
  0x4d   : > { %s2681_s25 = scalar_lea.vmem %s2881_s9, 256  ;;  %s2740_s26 = smov [#allocation3]  }
  0x4e   : > { %p2682_p1 = scmp.ne.s32.totalorder %s2881_s9, %s2681_s25  ;;  %s2686_s28 = sshll.u32 %s2740_s26, 4  ;;  %s2687_s28 = int_to_ptr.vmem [resolvable:$false] %s2686_s28 }
  0x4f   : > { %s2688_s21 = scalar_lea.vmem %s2687_s28, 512  ;;  %p2689_p10 = scmp.lt.s32.totalorder %s2881_s9, %s2687_s28 }
  0x50   : > { %p2684_p4 = pnand %p2682_p1, %p2668_p11  ;;  %p2690_p12 = scmp.lt.s32.totalorder %s2688_s21, %s2681_s25 }
  0x52   : > { %p2685_p5 = pneg %p2684_p4  ;;  %p2691_p0 = por %p2690_p12, %p2689_p10 }
  0x54   : > { %p2692_p2 = pnand %p2691_p0, %p2685_p5 }
  0x56   : > { %2695 = shalt.err (!%p2692_p2)
}
  0x57   : > { %s2741_s29 = smov 128   ;;  %s2742_s4 = smov 8  }
  0x58   : > { %2451 = dma.hbm_to_vmem [thread:$0]  (!%p2877_p7), %s2875_s8, 256, %s2881_s9, %s2883_s15, %s2741_s29, %s2741_s29, %s2742_s4  }
  0x59   : > { %p3115_p11 = scmp.ne.s32.totalorder %s3112_s18, 0 }
  0x5a   : > { %s178_s5 = sand.u32 (!%p3115_p11), 1, %s2726_s13   ;;  %p3116_p13 = scmp.ne.s32.totalorder (!%p3115_p11), %s3111_s17, 0 }
  0x5b   : > { %176 = sbr.rel (%p3115_p11) target bundleno = 1401 (0x579), region = 32  ;;  %s2914_s6 = sshll.u32 (!%p3115_p11), %s178_s5, 4 }
  0x5c   : > { %s179_s7 = scalar_lea.sflag (!%p3115_p11), [#allocation4], %s178_s5  ;;  %s182_s23 = scalar_lea.vmem (!%p3115_p11), [#allocation3], %s2914_s6 }
  0x62   : > { %2713 = dma.done.wait (%p3116_p13), %s179_s7, 256  }
  0x63   : > { %2715 = vsyncadd (%p3116_p13), %s179_s7, 4294967040  ;;  %p3117_p3 = scmp.eq.s32.totalorder %s2784_s16, 0 }
  0x65   : > { %2717 = dma.done.wait (%p3117_p3), [#allocation6], 14464   ;;  %p3118_p7 = pmov %p3117_p3 }
  0x66   : > { %v2743_v0 = vmov 0.0   ;;  %vm2744_vm0 = vmmov 0   ;;  %v2497_v1 = vld [vmem:[#allocation5 + $0x40] sm:$0xff]   ;;  %v2499_v3 = vld [vmem:[#allocation5 + $0x48] sm:$0xff]   ;;  %v2501_v5 = vld [vmem:[#allocation5 + $0x50] sm:$0xff]   ;;  %p213_p6 = scmp.lt.s32.totalorder %s2784_s16, 1 }
  0x67   : > { %2719 = vsyncadd (%p3118_p7), [#allocation6], 4294952832  ;;  %2151 = vmatprep.subr.bf16.mxu0 %v2743_v0  ;;  %219 = vst [vmem:[#allocation2] sm:$0xff] %v2743_v0  ;;  %2171 = vmatprep.subr.bf16.mxu1 %v2743_v0  ;;  %v2498_v2 = vld [vmem:[#allocation5] sm:$0xff]   ;;  %v2500_v4 = vld [vmem:[#allocation5 + $0x8] sm:$0xff]   ;;  %vm1800_vm1 = vcmask 31744  }
  0x68   : > { %2167 = vmatprep.mubr.msk.bf16.mxu0 %vm2744_vm0, %v2743_v0  ;;  %2187 = vmatprep.mubr.msk.bf16.mxu1 %vm2744_vm0, %v2743_v0  ;;  %v2502_v6 = vld [vmem:[#allocation5 + $0x10] sm:$0xff]   ;;  %v2503_v7 = vld [vmem:[#allocation5 + $0x58] sm:$0xff]   ;;  %v2505_v9 = vld [vmem:[#allocation5 + $0x60] sm:$0xff]   ;;  %s3124_s16 = smov (!%p213_p6, %s2784_s16), 1 }
  0x69   : > { %2152 = vmatpush3.bf16.msra.mxu0 %v2497_v1  ;;  %2172 = vmatpush3.bf16.msra.mxu1 %v2498_v2  ;;  %v2504_v8 = vld [vmem:[#allocation5 + $0x18] sm:$0xff]   ;;  %v2506_v10 = vld [vmem:[#allocation5 + $0x20] sm:$0xff]   ;;  %v2507_v13 = vld [vmem:[#allocation5 + $0x68] sm:$0xff]   ;;  %s2024_s17 = sshll.u32 %s3124_s16, 4 }
  0x6a   : > { %2153 = vmatprep.subr.bf16.mxu0 %v2743_v0  ;;  %2173 = vmatprep.subr.bf16.mxu1 %v2743_v0  ;;  %v220_v11 = vld [vmem:[%s182_s23] sm:$0xff]  ;;  %v221_v12 = vld [vmem:[%s182_s23 + $0x8] sm:$0xff]  ;;  %s217_s9 = scalar_lea.vmem %s3107_s3, %s2024_s17 }
  0x6b   : > { %222 = vst [vmem:[#allocation2 + $0x8] sm:$0xff] %v220_v11  ;;  %223 = vst [vmem:[#allocation2 + $0x10] sm:$0xff] %v221_v12  ;;  %v2508_v14 = vld [vmem:[#allocation5 + $0x28] sm:$0xff]   ;;  %v2509_v15 = vld [vmem:[#allocation5 + $0x70] sm:$0xff]   ;;  %v2963_v33 = vpack.c.bf16 %v221_v12, %v220_v11 }
  0x6c   : > { %v2510_v16 = vld [vmem:[#allocation5 + $0x30] sm:$0xff]   ;;  %v2511_v17 = vld [vmem:[#allocation5 + $0x78] sm:$0xff]   ;;  %v2513_v23 = vld [vmem:[#allocation5 + $0x80] sm:$0xff]  }
  0x6d   : > { %2154 = vmatpush3.bf16.msra.mxu0 %v2499_v3  ;;  %2174 = vmatpush3.bf16.msra.mxu1 %v2500_v4  ;;  %v2512_v20 = vld [vmem:[#allocation5 + $0x38] sm:$0xff]   ;;  %v2514_v26 = vld [vmem:[#allocation5 + $0x88] sm:$0xff]   ;;  %v2515_v27 = vld [vmem:[#allocation5 + $0x90] sm:$0xff]  }
  0x6e   : > { %2155 = vmatprep.subr.bf16.mxu0 %v2743_v0  ;;  %2175 = vmatprep.subr.bf16.mxu1 %v2743_v0  ;;  %v2516_v28 = vld [vmem:[#allocation5 + $0x98] sm:$0xff]   ;;  %v2517_v29 = vld [vmem:[#allocation5 + $0xa0] sm:$0xff]   ;;  %v2518_v30 = vld [vmem:[#allocation5 + $0xa8] sm:$0xff]  }
  0x6f   : > { %v2519_v31 = vld [vmem:[#allocation5 + $0xb0] sm:$0xff]   ;;  %v2520_v32 = vld [vmem:[#allocation5 + $0xb8] sm:$0xff]   ;;  %v2521_v34 = vld [vmem:[#allocation5 + $0x100] sm:$0xff]  }
  0x70   : > { %v2522_v35 = vld [vmem:[#allocation5 + $0xc0] sm:$0xff]   ;;  %v2523_v36 = vld [vmem:[#allocation5 + $0x108] sm:$0xff]   ;;  %v2525_v38 = vld [vmem:[#allocation5 + $0x110] sm:$0xff]  }
  0x71   : > { %2156 = vmatpush3.bf16.msra.mxu0 %v2501_v5  ;;  %2176 = vmatpush3.bf16.msra.mxu1 %v2502_v6  ;;  %v2524_v37 = vld [vmem:[#allocation5 + $0xc8] sm:$0xff]   ;;  %v2526_v39 = vld [vmem:[#allocation5 + $0xd0] sm:$0xff]   ;;  %v2527_v40 = vld [vmem:[#allocation5 + $0x118] sm:$0xff]  }
  0x72   : > { %2157 = vmatprep.subr.bf16.mxu0 %v2743_v0  ;;  %2177 = vmatprep.subr.bf16.mxu1 %v2743_v0  ;;  %v243_v18 = vld [vmem:[#allocation2 + $0x7] sm:$0xff]  ;;  %v244_v19 = vld [vmem:[#allocation2 + $0xf] sm:$0xff]  ;;  %v2529_v42 = vld [vmem:[#allocation5 + $0x120] sm:$0xff]  }
  0x73   : > { %v224_v21 = vld [vmem:[#allocation2 + $0x6] sm:$0xff]  ;;  %v225_v22 = vld [vmem:[#allocation2 + $0xe] sm:$0xff]  ;;  %v245_v24 = vpack.c.bf16 %v244_v19, %v243_v18  ;;  %v2530_v43 = vld [vmem:[#allocation5 + $0xe0] sm:$0xff]  }
  0x74   : > { %v226_v25 = vpack.c.bf16 %v225_v22, %v224_v21  ;;  %v2528_v41 = vld [vmem:[#allocation5 + $0xd8] sm:$0xff]   ;;  %v2531_v44 = vld [vmem:[#allocation5 + $0x128] sm:$0xff]   ;;  %v2533_v46 = vld [vmem:[#allocation5 + $0x130] sm:$0xff]  }
  0x75   : > { %2158 = vmatpush3.bf16.msra.mxu0 %v2503_v7  ;;  %2178 = vmatpush3.bf16.msra.mxu1 %v2504_v8  ;;  %v2532_v45 = vld [vmem:[#allocation5 + $0xe8] sm:$0xff]   ;;  %v2534_v47 = vld [vmem:[#allocation5 + $0xf0] sm:$0xff]   ;;  %v2535_v48 = vld [vmem:[#allocation5 + $0x138] sm:$0xff]  }
  0x76   : > { %2159 = vmatprep.subr.bf16.mxu0 %v2743_v0  ;;  %2179 = vmatprep.subr.bf16.mxu1 %v2743_v0  ;;  %v2536_v49 = vld [vmem:[#allocation5 + $0xf8] sm:$0xff]   ;;  %v1927_v61 = vld [vmem:[#allocation7] ss:$0 sm:$0xff]  ;;  %v2540_v18 = vld [vmem:[#allocation5 + $0x188] sm:$0xff]  }
  0x77   : > { %v2538_v11 = vld [vmem:[#allocation5 + $0x180] sm:$0xff]   ;;  %v2541_v19 = vld [vmem:[#allocation5 + $0x150] sm:$0xff]   ;;  %v2543_v21 = vld [vmem:[#allocation5 + $0x158] sm:$0xff]  }
  0x78   : > { %v2544_v22 = vld [vmem:[#allocation5 + $0x198] sm:$0xff]  }
  0x79   : > { %2160 = vmatpush3.bf16.msra.mxu0 %v2505_v9  ;;  %2180 = vmatpush3.bf16.msra.mxu1 %v2506_v10  ;;  %v2537_v10 = vld [vmem:[#allocation5 + $0x140] sm:$0xff]  }
  0x7a   : > { %2161 = vmatprep.subr.bf16.mxu0 %v2743_v0  ;;  %2181 = vmatprep.subr.bf16.mxu1 %v2743_v0 }
  0x7d   : > { %2162 = vmatpush3.bf16.msra.mxu0 %v2507_v13  ;;  %2182 = vmatpush3.bf16.msra.mxu1 %v2508_v14 }
  0x7e   : > { %2163 = vmatprep.subr.bf16.mxu0 %v2743_v0  ;;  %2183 = vmatprep.subr.bf16.mxu1 %v2743_v0 }
  0x81   : > { %2164 = vmatpush3.bf16.msra.mxu0 %v2509_v15  ;;  %2184 = vmatpush3.bf16.msra.mxu1 %v2510_v16 }
  0x82   : > { %2165 = vmatprep.subr.bf16.mxu0 %v2743_v0  ;;  %2185 = vmatprep.subr.bf16.mxu1 %v2743_v0 }
  0x85   : > { %2166 = vmatpush3.bf16.msra.mxu0 %v2511_v17  ;;  %2186 = vmatpush3.bf16.msra.mxu1 %v2512_v20  ;;  %v2539_v17 = vld [vmem:[#allocation5 + $0x148] sm:$0xff]   ;;  %v2542_v20 = vld [vmem:[#allocation5 + $0x190] sm:$0xff]  }
  0x86   : > { %2191 = vmatprep.subr.bf16.mxu0 %v2743_v0  ;;  %2211 = vmatprep.subr.bf16.mxu1 %v2743_v0 }
  0x88   : > { %2168 = vmatmul.mubr.bf16.vlgmr.msra.gmra.mrb[0].mxu0 %v245_v24  ;;  %2188 = vmatmul.mubr.bf16.vlgmr.msra.gmra.mrb[0].mxu1 %v226_v25  ;;  %v2546_v24 = vld [vmem:[#allocation5 + $0x1a0] sm:$0xff]   ;;  %v2547_v25 = vld [vmem:[#allocation5 + $0x168] sm:$0xff]  }
  0x89   : > { %2192 = vmatpush3.bf16.msra.mxu0 %v2513_v23  ;;  %2207 = vmatprep.mubr.msk.bf16.mxu0 %vm2744_vm0, %v2743_v0  ;;  %v2545_v23 = vld [vmem:[#allocation5 + $0x160] sm:$0xff]  }
  0x8a   : > { %2193 = vmatprep.subr.bf16.mxu0 %v2743_v0  ;;  %2227 = vmatprep.mubr.msk.bf16.mxu1 %vm2744_vm0, %v2743_v0 }
  0x8b   : > { %2212 = vmatpush3.bf16.msra.mxu1 %v2521_v34  ;;  %v2555_v34 = vld [vmem:[#allocation5 + $0x208] sm:$0xff]  }
  0x8c   : > { %2213 = vmatprep.subr.bf16.mxu1 %v2743_v0 }
  0x8d   : > { %2194 = vmatpush3.bf16.msra.mxu0 %v2514_v26  ;;  %v2548_v26 = vld [vmem:[#allocation5 + $0x1a8] sm:$0xff]  }
  0x8e   : > { %2195 = vmatprep.subr.bf16.mxu0 %v2743_v0 }
  0x8f   : > { %2214 = vmatpush3.bf16.msra.mxu1 %v2523_v36  ;;  %v2557_v36 = vld [vmem:[#allocation5 + $0x210] sm:$0xff]  }
  0x90   : > { %2215 = vmatprep.subr.bf16.mxu1 %v2743_v0 }
  0x91   : > { %2196 = vmatpush3.bf16.msra.mxu0 %v2515_v27  ;;  %v2549_v27 = vld [vmem:[#allocation5 + $0x170] sm:$0xff]  }
  0x92   : > { %2197 = vmatprep.subr.bf16.mxu0 %v2743_v0 }
  0x93   : > { %2216 = vmatpush3.bf16.msra.mxu1 %v2525_v38  ;;  %v2560_v38 = vld [vmem:[#allocation5 + $0x1d8] sm:$0xff]  }
  0x94   : > { %2217 = vmatprep.subr.bf16.mxu1 %v2743_v0 }
  0x95   : > { %2198 = vmatpush3.bf16.msra.mxu0 %v2516_v28  ;;  %v2550_v28 = vld [vmem:[#allocation5 + $0x1b0] sm:$0xff]  }
  0x96   : > { %2199 = vmatprep.subr.bf16.mxu0 %v2743_v0 }
  0x97   : > { %2218 = vmatpush3.bf16.msra.mxu1 %v2527_v40  ;;  %v2562_v40 = vld [vmem:[#allocation5 + $0x1e0] sm:$0xff]  }
  0x98   : > { %2219 = vmatprep.subr.bf16.mxu1 %v2743_v0 }
  0x99   : > { %2200 = vmatpush3.bf16.msra.mxu0 %v2517_v29  ;;  %v2551_v29 = vld [vmem:[#allocation5 + $0x178] sm:$0xff]  }
  0x9a   : > { %2201 = vmatprep.subr.bf16.mxu0 %v2743_v0 }
  0x9b   : > { %2220 = vmatpush3.bf16.msra.mxu1 %v2529_v42  ;;  %v2564_v42 = vld [vmem:[#allocation5 + $0x1e8] sm:$0xff]  }
  0x9c   : > { %2221 = vmatprep.subr.bf16.mxu1 %v2743_v0 }
  0x9d   : > { %2202 = vmatpush3.bf16.msra.mxu0 %v2518_v30  ;;  %v2552_v30 = vld [vmem:[#allocation5 + $0x1b8] sm:$0xff]  }
  0x9e   : > { %2203 = vmatprep.subr.bf16.mxu0 %v2743_v0 }
  0x9f   : > { %2222 = vmatpush3.bf16.msra.mxu1 %v2531_v44  ;;  %v2566_v44 = vld [vmem:[#allocation5 + $0x1f0] sm:$0xff]  }
  0xa0   : > { %2223 = vmatprep.subr.bf16.mxu1 %v2743_v0 }
  0xa1   : > { %2204 = vmatpush3.bf16.msra.mxu0 %v2519_v31  ;;  %v2553_v31 = vld [vmem:[#allocation5 + $0x200] sm:$0xff]  }
  0xa2   : > { %2205 = vmatprep.subr.bf16.mxu0 %v2743_v0 }
  0xa3   : > { %2224 = vmatpush3.bf16.msra.mxu1 %v2533_v46  ;;  %v2568_v46 = vld [vmem:[#allocation5 + $0x1f8] sm:$0xff]  }
  0xa4   : > { %2225 = vmatprep.subr.bf16.mxu1 %v2743_v0 }
  0xa5   : > { %2206 = vmatpush3.bf16.msra.mxu0 %v2520_v32  ;;  %v2554_v32 = vld [vmem:[#allocation5 + $0x1c0] sm:$0xff]  }
  0xa6   : > { %2231 = vmatprep.subr.bf16.mxu0 %v2743_v0 }
  0xa7   : > { %2226 = vmatpush3.bf16.msra.mxu1 %v2535_v48 }
  0xa8   : > { %2208 = vmatmul.mubr.bf16.vlgmr.msra.gmra.mrb[4].mxu0 %v2963_v33  ;;  %2251 = vmatprep.subr.bf16.mxu1 %v2743_v0 }
  0xa9   : > { %2247 = vmatprep.mubr.msk.bf16.mxu0 %vm2744_vm0, %v2743_v0  ;;  %2232 = vmatpush3.bf16.msra.mxu0 %v2522_v35  ;;  %v2556_v35 = vld [vmem:[#allocation5 + $0x1c8] sm:$0xff]  }
  0xaa   : > { %2233 = vmatprep.subr.bf16.mxu0 %v2743_v0 }
  0xad   : > { %2234 = vmatpush3.bf16.msra.mxu0 %v2524_v37  ;;  %v2559_v37 = vld [vmem:[#allocation5 + $0x218] sm:$0xff]  }
  0xae   : > { %2235 = vmatprep.subr.bf16.mxu0 %v2743_v0 }
  0xb1   : > { %2236 = vmatpush3.bf16.msra.mxu0 %v2526_v39  ;;  %v2561_v39 = vld [vmem:[#allocation5 + $0x220] sm:$0xff]  }
  0xb2   : > { %2237 = vmatprep.subr.bf16.mxu0 %v2743_v0 }
  0xb5   : > { %2238 = vmatpush3.bf16.msra.mxu0 %v2528_v41  ;;  %v2563_v41 = vld [vmem:[#allocation5 + $0x228] sm:$0xff]  }
  0xb6   : > { %2239 = vmatprep.subr.bf16.mxu0 %v2743_v0 }
  0xb9   : > { %2240 = vmatpush3.bf16.msra.mxu0 %v2530_v43  ;;  %v2565_v43 = vld [vmem:[#allocation5 + $0x230] sm:$0xff]  }
  0xba   : > { %2241 = vmatprep.subr.bf16.mxu0 %v2743_v0 }
  0xbd   : > { %2242 = vmatpush3.bf16.msra.mxu0 %v2532_v45  ;;  %v2567_v45 = vld [vmem:[#allocation5 + $0x238] sm:$0xff]  }
  0xbe   : > { %2243 = vmatprep.subr.bf16.mxu0 %v2743_v0 }
  0xc1   : > { %2244 = vmatpush3.bf16.msra.mxu0 %v2534_v47 }
  0xc2   : > { %2245 = vmatprep.subr.bf16.mxu0 %v2743_v0 }
  0xc5   : > { %2246 = vmatpush3.bf16.msra.mxu0 %v2536_v49 }
  0xc6   : > { %2271 = vmatprep.subr.bf16.mxu0 %v2743_v0 }
 0x15b   : > { %v344_v50 = vpop.f32.mrb[0].mxu0  ;;  %v433_v51 = vpop.f32.mrb[0].mxu1 }
 0x15c   : > { %v2169_v52 = vpop.f32.mrb[1].mxu0  ;;  %v434_v53 = vadd.f32 %v433_v51, %v344_v50  ;;  %v2189_v54 = vpop.f32.mrb[1].mxu1 }
 0x15d   : > { %v347_v55 = vpop.f32.mrb[2].mxu0  ;;  %v436_v56 = vpop.f32.mrb[2].mxu1 }
 0x15e   : > { %v2170_v57 = vpop.f32.mrb[3].mxu0  ;;  %v437_v58 = vadd.f32 %v436_v56, %v347_v55  ;;  %v2190_v59 = vpop.f32.mrb[3].mxu1 }
 0x15f   : > { %v1953_v59 = vld [vmem:[#allocation7 + $0x2] ss:$0 sm:$0xff] }
 0x17b   : > { %v541_v60 = vpop.f32.mrb[4].mxu0 }
 0x17c   : > { %v548_v62 = vadd.f32 %v541_v60, %v434_v53  ;;  %v2209_v63 = vpop.f32.mrb[5].mxu0 }
 0x17d   : > { %v544_v1 = vpop.f32.mrb[6].mxu0 }
 0x17e   : > { %v555_v2 = vadd.f32 %v1927_v61, %v548_v62  ;;  %v549_v3 = vadd.f32 %v544_v1, %v437_v58  ;;  %v2210_v4 = vpop.f32.mrb[7].mxu0  ;;  %v1952_v58 = vld [vmem:[#allocation7 + $0x1] ss:$0 sm:$0xff] }
 0x180   : > { %v557_v5 = vmax.f32 %v555_v2, 0.0  ;;  %v556_v6 = vadd.f32 %v1927_v61, %v549_v3 }
 0x182   : > { %559 = vst [vmem:[#allocation2 + $0x8] sm:$0xff] %v557_v5  ;;  %v558_v7 = vmax.f32 %v556_v6, 0.0 }
 0x184   : > { %560 = vst [vmem:[#allocation2 + $0x10] sm:$0xff] %v558_v7  ;;  %v779_v8 = vpack.c.bf16 %v558_v7, %v557_v5 }
 0x189   : > { %v580_v9 = vld [vmem:[#allocation2 + $0x7] sm:$0xff] }
 0x18a   : > { %v561_v13 = vld [vmem:[#allocation2 + $0x6] sm:$0xff] }
 0x18b   : > { %v581_v12 = vld [vmem:[#allocation2 + $0xf] sm:$0xff] }
 0x18c   : > { %v562_v14 = vld [vmem:[#allocation2 + $0xe] sm:$0xff]  ;;  %v582_v15 = vpack.c.bf16 %v581_v12, %v580_v9 }
 0x18d   : > { %v563_v16 = vpack.c.bf16 %v562_v14, %v561_v13 }
 0x18e   : > { %2228 = vmatmul.mubr.bf16.vlgmr.msra.gmra.mrb[4].mxu1 %v582_v15 }
 0x18f   : > { %2248 = vmatmul.mubr.bf16.vlgmr.msra.gmra.mrb[8].mxu0 %v563_v16  ;;  %2252 = vmatpush3.bf16.msra.mxu1 %v2537_v10  ;;  %v2569_v16 = vld [vmem:[#allocation5 + $0x240] sm:$0xff]  }
 0x190   : > { %2272 = vmatpush3.bf16.msra.mxu0 %v2538_v11  ;;  %2253 = vmatprep.subr.bf16.mxu1 %v2743_v0 }
 0x191   : > { %2273 = vmatprep.subr.bf16.mxu0 %v2743_v0  ;;  %2267 = vmatprep.mubr.msk.bf16.mxu1 %vm2744_vm0, %v2743_v0 }
 0x192   : > { %2287 = vmatprep.mubr.msk.bf16.mxu0 %vm2744_vm0, %v2743_v0 }
 0x193   : > { %2254 = vmatpush3.bf16.msra.mxu1 %v2539_v17 }
 0x194   : > { %2274 = vmatpush3.bf16.msra.mxu0 %v2540_v18  ;;  %2255 = vmatprep.subr.bf16.mxu1 %v2743_v0 }
 0x195   : > { %2275 = vmatprep.subr.bf16.mxu0 %v2743_v0 }
 0x197   : > { %2256 = vmatpush3.bf16.msra.mxu1 %v2541_v19 }
 0x198   : > { %2276 = vmatpush3.bf16.msra.mxu0 %v2542_v20  ;;  %2257 = vmatprep.subr.bf16.mxu1 %v2743_v0 }
 0x199   : > { %2277 = vmatprep.subr.bf16.mxu0 %v2743_v0 }
 0x19b   : > { %2258 = vmatpush3.bf16.msra.mxu1 %v2543_v21 }
 0x19c   : > { %2278 = vmatpush3.bf16.msra.mxu0 %v2544_v22  ;;  %2259 = vmatprep.subr.bf16.mxu1 %v2743_v0  ;;  %v2570_v22 = vld [vmem:[#allocation5 + $0x248] sm:$0xff]  }
 0x19d   : > { %2279 = vmatprep.subr.bf16.mxu0 %v2743_v0 }
 0x19f   : > { %2260 = vmatpush3.bf16.msra.mxu1 %v2545_v23  ;;  %v3032_v23 = vld [vmem:[#allocation2] sm:$0xff] }
 0x1a0   : > { %2280 = vmatpush3.bf16.msra.mxu0 %v2546_v24  ;;  %2261 = vmatprep.subr.bf16.mxu1 %v2743_v0  ;;  %v2571_v24 = vld [vmem:[#allocation5 + $0x250] sm:$0xff]  }
 0x1a1   : > { %2281 = vmatprep.subr.bf16.mxu0 %v2743_v0 }
 0x1a3   : > { %2262 = vmatpush3.bf16.msra.mxu1 %v2547_v25  ;;  %v2572_v25 = vld [vmem:[#allocation5 + $0x258] sm:$0xff]  }
 0x1a4   : > { %2282 = vmatpush3.bf16.msra.mxu0 %v2548_v26  ;;  %2263 = vmatprep.subr.bf16.mxu1 %v2743_v0  ;;  %v2573_v26 = vld [vmem:[#allocation5 + $0x260] sm:$0xff]  }
 0x1a5   : > { %2283 = vmatprep.subr.bf16.mxu0 %v2743_v0 }
 0x1a7   : > { %2264 = vmatpush3.bf16.msra.mxu1 %v2549_v27  ;;  %v2574_v27 = vld [vmem:[#allocation5 + $0x268] sm:$0xff]  }
 0x1a8   : > { %2284 = vmatpush3.bf16.msra.mxu0 %v2550_v28  ;;  %2265 = vmatprep.subr.bf16.mxu1 %v2743_v0  ;;  %v2575_v28 = vld [vmem:[#allocation5 + $0x270] sm:$0xff]  }
 0x1a9   : > { %2285 = vmatprep.subr.bf16.mxu0 %v2743_v0 }
 0x1ab   : > { %2266 = vmatpush3.bf16.msra.mxu1 %v2551_v29  ;;  %v2576_v29 = vld [vmem:[#allocation5 + $0x278] sm:$0xff]  }
 0x1ac   : > { %2286 = vmatpush3.bf16.msra.mxu0 %v2552_v30  ;;  %2291 = vmatprep.subr.bf16.mxu1 %v2743_v0 }
 0x1ad   : > { %2311 = vmatprep.subr.bf16.mxu0 %v2743_v0 }
 0x1ae   : > { %2268 = vmatmul.mubr.bf16.vlgmr.msra.gmra.mrb[8].mxu1 %v779_v8 }
 0x1af   : > { %2288 = vmatmul.mubr.bf16.vlgmr.msra.gmra.mrb[12].mxu0 %v2963_v33  ;;  %2307 = vmatprep.mubr.msk.bf16.mxu1 %vm2744_vm0, %v2743_v0  ;;  %v2558_v33 = vld [vmem:[#allocation5 + $0x1d0] sm:$0xff]  }
 0x1b0   : > { %2327 = vmatprep.mubr.msk.bf16.mxu0 %vm2744_vm0, %v2743_v0  ;;  %2292 = vmatpush3.bf16.msra.mxu1 %v2553_v31  ;;  %v2577_v31 = vld [vmem:[#allocation5 + $0x2c0] sm:$0xff]  }
 0x1b1   : > { %2312 = vmatpush3.bf16.msra.mxu0 %v2554_v32  ;;  %2293 = vmatprep.subr.bf16.mxu1 %v2743_v0  ;;  %v2578_v32 = vld [vmem:[#allocation5 + $0x280] sm:$0xff]  }
 0x1b2   : > { %2313 = vmatprep.subr.bf16.mxu0 %v2743_v0 }
 0x1b4   : > { %2294 = vmatpush3.bf16.msra.mxu1 %v2555_v34  ;;  %v2579_v34 = vld [vmem:[#allocation5 + $0x2c8] sm:$0xff]  }
 0x1b5   : > { %2314 = vmatpush3.bf16.msra.mxu0 %v2556_v35  ;;  %2295 = vmatprep.subr.bf16.mxu1 %v2743_v0  ;;  %v2580_v35 = vld [vmem:[#allocation5 + $0x288] sm:$0xff]  }
 0x1b6   : > { %2315 = vmatprep.subr.bf16.mxu0 %v2743_v0 }
 0x1b8   : > { %2296 = vmatpush3.bf16.msra.mxu1 %v2557_v36  ;;  %v2581_v36 = vld [vmem:[#allocation5 + $0x2d0] sm:$0xff]  }
 0x1b9   : > { %2297 = vmatprep.subr.bf16.mxu1 %v2743_v0  ;;  %2316 = vmatpush3.bf16.msra.mxu0 %v2558_v33  ;;  %v2582_v33 = vld [vmem:[#allocation5 + $0x290] sm:$0xff]  }
 0x1ba   : > { %2317 = vmatprep.subr.bf16.mxu0 %v2743_v0 }
 0x1bc   : > { %2298 = vmatpush3.bf16.msra.mxu1 %v2559_v37  ;;  %v2583_v37 = vld [vmem:[#allocation5 + $0x2d8] sm:$0xff]  }
 0x1bd   : > { %2318 = vmatpush3.bf16.msra.mxu0 %v2560_v38  ;;  %2299 = vmatprep.subr.bf16.mxu1 %v2743_v0  ;;  %v2584_v38 = vld [vmem:[#allocation5 + $0x298] sm:$0xff]  }
 0x1be   : > { %2319 = vmatprep.subr.bf16.mxu0 %v2743_v0 }
 0x1c0   : > { %2300 = vmatpush3.bf16.msra.mxu1 %v2561_v39  ;;  %v2585_v39 = vld [vmem:[#allocation5 + $0x2e0] sm:$0xff]  }
 0x1c1   : > { %2320 = vmatpush3.bf16.msra.mxu0 %v2562_v40  ;;  %2301 = vmatprep.subr.bf16.mxu1 %v2743_v0  ;;  %v2586_v40 = vld [vmem:[#allocation5 + $0x2a0] sm:$0xff]  }
 0x1c2   : > { %2321 = vmatprep.subr.bf16.mxu0 %v2743_v0 }
 0x1c4   : > { %2302 = vmatpush3.bf16.msra.mxu1 %v2563_v41  ;;  %v2587_v41 = vld [vmem:[#allocation5 + $0x2e8] sm:$0xff]  }
 0x1c5   : > { %2322 = vmatpush3.bf16.msra.mxu0 %v2564_v42  ;;  %2303 = vmatprep.subr.bf16.mxu1 %v2743_v0  ;;  %v2588_v42 = vld [vmem:[#allocation5 + $0x2a8] sm:$0xff]  }
 0x1c6   : > { %2323 = vmatprep.subr.bf16.mxu0 %v2743_v0 }
 0x1c8   : > { %2304 = vmatpush3.bf16.msra.mxu1 %v2565_v43  ;;  %v2589_v43 = vld [vmem:[#allocation5 + $0x2f0] sm:$0xff]  }
 0x1c9   : > { %2324 = vmatpush3.bf16.msra.mxu0 %v2566_v44  ;;  %2305 = vmatprep.subr.bf16.mxu1 %v2743_v0  ;;  %v2590_v44 = vld [vmem:[#allocation5 + $0x2b0] sm:$0xff]  }
 0x1ca   : > { %2325 = vmatprep.subr.bf16.mxu0 %v2743_v0 }
 0x1cc   : > { %2306 = vmatpush3.bf16.msra.mxu1 %v2567_v45  ;;  %v2591_v45 = vld [vmem:[#allocation5 + $0x2f8] sm:$0xff]  }
 0x1cd   : > { %2326 = vmatpush3.bf16.msra.mxu0 %v2568_v46  ;;  %2331 = vmatprep.subr.bf16.mxu1 %v2743_v0  ;;  %v2592_v46 = vld [vmem:[#allocation5 + $0x2b8] sm:$0xff]  }
 0x1ce   : > { %2351 = vmatprep.subr.bf16.mxu0 %v2743_v0 }
 0x261   : > { %v681_v47 = vpop.f32.mrb[4].mxu1 }
 0x262   : > { %v770_v48 = vpop.f32.mrb[8].mxu0  ;;  %v2229_v50 = vpop.f32.mrb[5].mxu1 }
 0x263   : > { %v771_v49 = vadd.f32 %v770_v48, %v681_v47  ;;  %v2249_v51 = vpop.f32.mrb[9].mxu0  ;;  %v684_v52 = vpop.f32.mrb[6].mxu1 }
 0x264   : > { %v773_v53 = vpop.f32.mrb[10].mxu0  ;;  %v2230_v55 = vpop.f32.mrb[7].mxu1 }
 0x265   : > { %v774_v54 = vadd.f32 %v773_v53, %v684_v52  ;;  %v2250_v56 = vpop.f32.mrb[11].mxu0 }
 0x281   : > { %v878_v57 = vpop.f32.mrb[8].mxu1 }
 0x282   : > { %v1000_v60 = vpop.f32.mrb[12].mxu0  ;;  %v885_v61 = vadd.f32 %v878_v57, %v771_v49  ;;  %v2269_v62 = vpop.f32.mrb[9].mxu1 }
 0x283   : > { %v2289_v63 = vpop.f32.mrb[13].mxu0  ;;  %v881_v1 = vpop.f32.mrb[10].mxu1  ;;  %v1001_v3 = vadd.f32 %v1953_v59, %v1000_v60 }
 0x284   : > { %v1003_v2 = vpop.f32.mrb[14].mxu0  ;;  %v892_v0 = vadd.f32 %v1952_v58, %v885_v61  ;;  %v886_v4 = vadd.f32 %v881_v1, %v774_v54  ;;  %v2270_v5 = vpop.f32.mrb[11].mxu1 }
 0x285   : > { %v2290_v6 = vpop.f32.mrb[15].mxu0  ;;  %v1004_v11 = vadd.f32 %v1953_v59, %v1003_v2 }
 0x286   : > { %v894_v7 = vmax.f32 %v892_v0, 0.0  ;;  %v893_v8 = vadd.f32 %v1952_v58, %v886_v4  ;;  %v1986_v58 = vld [vmem:[#allocation7 + $0x3] ss:$0 sm:$0xff] }
 0x287   : > { %v2593_v6 = vld [vmem:[#allocation5 + $0x300] sm:$0xff]  }
 0x288   : > { %v1007_v9 = vadd.f32 %v1001_v3, %v894_v7  ;;  %v895_v10 = vmax.f32 %v893_v8, 0.0 }
 0x28a   : > { %v3026_v12 = vmax.f32 %v1007_v9, 0.0  ;;  %v1008_v13 = vadd.f32 %v1004_v11, %v895_v10 }
 0x28c   : > { %1011 = vst [vmem:[#allocation2 + $0x8] sm:$0xff] %v3026_v12  ;;  %v3029_v14 = vmax.f32 %v1008_v13, 0.0  ;;  %v2594_v13 = vld [vmem:[#allocation5 + $0x308] sm:$0xff]  }
 0x28e   : > { %1012 = vst [vmem:[#allocation2 + $0x10] sm:$0xff] %v3029_v14  ;;  %v1231_v30 = vpack.c.bf16 %v3029_v14, %v3026_v12 }
 0x293   : > { %v1032_v15 = vld [vmem:[#allocation2 + $0x6] sm:$0xff] }
 0x294   : > { %v1013_v18 = vld [vmem:[#allocation2 + $0x4] sm:$0xff] }
 0x295   : > { %v1033_v17 = vld [vmem:[#allocation2 + $0xe] sm:$0xff] }
 0x296   : > { %v1014_v19 = vld [vmem:[#allocation2 + $0xc] sm:$0xff]  ;;  %v1034_v20 = vpack.c.bf16 %v1033_v17, %v1032_v15  ;;  %v2597_v17 = vld [vmem:[#allocation5 + $0x320] sm:$0xff]  }
 0x297   : > { %v1015_v21 = vpack.c.bf16 %v1014_v19, %v1013_v18  ;;  %v2595_v15 = vld [vmem:[#allocation5 + $0x310] sm:$0xff]   ;;  %v2598_v18 = vld [vmem:[#allocation5 + $0x328] sm:$0xff]  }
 0x298   : > { %2308 = vmatmul.mubr.bf16.vlgmr.msra.gmra.mrb[12].mxu1 %v1034_v20  ;;  %v2599_v19 = vld [vmem:[#allocation5 + $0x330] sm:$0xff]   ;;  %v2600_v20 = vld [vmem:[#allocation5 + $0x338] sm:$0xff]  }
 0x299   : > { %2328 = vmatmul.mubr.bf16.vlgmr.msra.gmra.mrb[16].mxu0 %v1015_v21  ;;  %2332 = vmatpush3.bf16.msra.mxu1 %v2569_v16  ;;  %v2596_v16 = vld [vmem:[#allocation5 + $0x318] sm:$0xff]   ;;  %v2601_v21 = vld [vmem:[#allocation5 + $0x340] sm:$0xff]  }
 0x29a   : > { %2347 = vmatprep.mubr.msk.bf16.mxu1 %vm2744_vm0, %v3032_v23  ;;  %2333 = vmatprep.subr.bf16.mxu1 %v3032_v23 }
 0x29b   : > { %2367 = vmatprep.mubr.msk.bf16.mxu0 %vm2744_vm0, %v3032_v23  ;;  %2352 = vmatpush3.bf16.msra.mxu0 %v2577_v31 }
 0x29c   : > { %2353 = vmatprep.subr.bf16.mxu0 %v3032_v23 }
 0x29d   : > { %2334 = vmatpush3.bf16.msra.mxu1 %v2570_v22  ;;  %v2602_v22 = vld [vmem:[#allocation5 + $0x348] sm:$0xff]  }
 0x29e   : > { %2335 = vmatprep.subr.bf16.mxu1 %v3032_v23 }
 0x29f   : > { %2354 = vmatpush3.bf16.msra.mxu0 %v2579_v34 }
 0x2a0   : > { %2355 = vmatprep.subr.bf16.mxu0 %v3032_v23 }
 0x2a1   : > { %2336 = vmatpush3.bf16.msra.mxu1 %v2571_v24  ;;  %v2603_v24 = vld [vmem:[#allocation5 + $0x350] sm:$0xff]  }
 0x2a2   : > { %2337 = vmatprep.subr.bf16.mxu1 %v3032_v23 }
 0x2a3   : > { %2356 = vmatpush3.bf16.msra.mxu0 %v2581_v36 }
 0x2a4   : > { %2357 = vmatprep.subr.bf16.mxu0 %v3032_v23 }
 0x2a5   : > { %2338 = vmatpush3.bf16.msra.mxu1 %v2572_v25  ;;  %v2604_v25 = vld [vmem:[#allocation5 + $0x358] sm:$0xff]  }
 0x2a6   : > { %2339 = vmatprep.subr.bf16.mxu1 %v3032_v23 }
 0x2a7   : > { %2358 = vmatpush3.bf16.msra.mxu0 %v2583_v37 }
 0x2a8   : > { %2359 = vmatprep.subr.bf16.mxu0 %v3032_v23 }
 0x2a9   : > { %2340 = vmatpush3.bf16.msra.mxu1 %v2573_v26  ;;  %v2605_v26 = vld [vmem:[#allocation5 + $0x360] sm:$0xff]  }
 0x2aa   : > { %2341 = vmatprep.subr.bf16.mxu1 %v3032_v23 }
 0x2ab   : > { %2360 = vmatpush3.bf16.msra.mxu0 %v2585_v39 }
 0x2ac   : > { %2361 = vmatprep.subr.bf16.mxu0 %v3032_v23 }
 0x2ad   : > { %2342 = vmatpush3.bf16.msra.mxu1 %v2574_v27  ;;  %v2606_v27 = vld [vmem:[#allocation5 + $0x368] sm:$0xff]  }
 0x2ae   : > { %2343 = vmatprep.subr.bf16.mxu1 %v3032_v23 }
 0x2af   : > { %2362 = vmatpush3.bf16.msra.mxu0 %v2587_v41  ;;  %v2011_v41 = vld [vmem:[#allocation7 + $0x4] ss:$0 sm:$0xff] }
 0x2b0   : > { %2363 = vmatprep.subr.bf16.mxu0 %v3032_v23 }
 0x2b1   : > { %2344 = vmatpush3.bf16.msra.mxu1 %v2575_v28  ;;  %v2607_v28 = vld [vmem:[#allocation5 + $0x370] sm:$0xff]  }
 0x2b2   : > { %2345 = vmatprep.subr.bf16.mxu1 %v3032_v23 }
 0x2b3   : > { %2364 = vmatpush3.bf16.msra.mxu0 %v2589_v43 }
 0x2b4   : > { %2365 = vmatprep.subr.bf16.mxu0 %v3032_v23 }
 0x2b5   : > { %2346 = vmatpush3.bf16.msra.mxu1 %v2576_v29  ;;  %v2608_v29 = vld [vmem:[#allocation5 + $0x378] sm:$0xff]  }
 0x2b6   : > { %2371 = vmatprep.subr.bf16.mxu1 %v3032_v23 }
 0x2b7   : > { %2366 = vmatpush3.bf16.msra.mxu0 %v2591_v45 }
 0x2b8   : > { %2348 = vmatmul.mubr.bf16.vlgmr.msra.gmra.mrb[16].mxu1 %v1231_v30  ;;  %2391 = vmatprep.subr.bf16.mxu0 %v3032_v23 }
 0x2b9   : > { %2387 = vmatprep.mubr.msk.bf16.mxu1 %vm2744_vm0, %v3032_v23  ;;  %2372 = vmatpush3.bf16.msra.mxu1 %v2578_v32 }
 0x2ba   : > { %2373 = vmatprep.subr.bf16.mxu1 %v3032_v23 }
 0x2bd   : > { %2374 = vmatpush3.bf16.msra.mxu1 %v2580_v35 }
 0x2be   : > { %2375 = vmatprep.subr.bf16.mxu1 %v3032_v23 }
 0x2c1   : > { %2376 = vmatpush3.bf16.msra.mxu1 %v2582_v33 }
 0x2c2   : > { %2377 = vmatprep.subr.bf16.mxu1 %v3032_v23 }
 0x2c5   : > { %2378 = vmatpush3.bf16.msra.mxu1 %v2584_v38 }
 0x2c6   : > { %2379 = vmatprep.subr.bf16.mxu1 %v3032_v23 }
 0x2c9   : > { %2380 = vmatpush3.bf16.msra.mxu1 %v2586_v40 }
 0x2ca   : > { %2381 = vmatprep.subr.bf16.mxu1 %v3032_v23 }
 0x2cd   : > { %2382 = vmatpush3.bf16.msra.mxu1 %v2588_v42 }
 0x2ce   : > { %2383 = vmatprep.subr.bf16.mxu1 %v3032_v23 }
 0x2d1   : > { %2384 = vmatpush3.bf16.msra.mxu1 %v2590_v44 }
 0x2d2   : > { %2385 = vmatprep.subr.bf16.mxu1 %v3032_v23 }
 0x2d5   : > { %2386 = vmatpush3.bf16.msra.mxu1 %v2592_v46 }
 0x2d6   : > { %2411 = vmatprep.subr.bf16.mxu1 %v3032_v23 }
 0x36b   : > { %v1133_v47 = vpop.f32.mrb[12].mxu1 }
 0x36c   : > { %v1222_v48 = vpop.f32.mrb[16].mxu0  ;;  %v2309_v50 = vpop.f32.mrb[13].mxu1 }
 0x36d   : > { %v1223_v49 = vadd.f32 %v1222_v48, %v1133_v47  ;;  %v2329_v51 = vpop.f32.mrb[17].mxu0  ;;  %v1136_v52 = vpop.f32.mrb[14].mxu1 }
 0x36e   : > { %v1225_v53 = vpop.f32.mrb[18].mxu0  ;;  %v2310_v55 = vpop.f32.mrb[15].mxu1 }
 0x36f   : > { %v1226_v54 = vadd.f32 %v1225_v53, %v1136_v52  ;;  %v2330_v56 = vpop.f32.mrb[19].mxu0  ;;  %v2012_v55 = vld [vmem:[#allocation7 + $0x5] ss:$0 sm:$0xff] }
 0x38b   : > { %v1330_v57 = vpop.f32.mrb[16].mxu1 }
 0x38c   : > { %v1337_v59 = vadd.f32 %v1330_v57, %v1223_v49  ;;  %v2349_v60 = vpop.f32.mrb[17].mxu1 }
 0x38d   : > { %v1333_v61 = vpop.f32.mrb[18].mxu1 }
 0x38e   : > { %v1344_v62 = vadd.f32 %v1986_v58, %v1337_v59  ;;  %v1338_v63 = vadd.f32 %v1333_v61, %v1226_v54  ;;  %v2350_v1 = vpop.f32.mrb[19].mxu1 }
 0x390   : > { %v1346_v2 = vmax.f32 %v1344_v62, 0.0  ;;  %v1345_v0 = vadd.f32 %v1986_v58, %v1338_v63 }
 0x392   : > { %1348 = vst [vmem:[#allocation2 + $0x8] sm:$0xff] %v1346_v2  ;;  %v1347_v3 = vmax.f32 %v1345_v0, 0.0 }
 0x394   : > { %1349 = vst [vmem:[#allocation2 + $0x10] sm:$0xff] %v1347_v3  ;;  %v1568_v4 = vpack.c.bf16 %v1347_v3, %v1346_v2 }
 0x399   : > { %v1369_v5 = vld [vmem:[#allocation2 + $0x6] sm:$0xff] }
 0x39a   : > { %v1350_v8 = vld [vmem:[#allocation2 + $0x4] sm:$0xff] }
 0x39b   : > { %v1370_v7 = vld [vmem:[#allocation2 + $0xe] sm:$0xff] }
 0x39c   : > { %v1351_v9 = vld [vmem:[#allocation2 + $0xc] sm:$0xff]  ;;  %v1371_v10 = vpack.c.bf16 %v1370_v7, %v1369_v5 }
 0x39d   : > { %v1352_v11 = vpack.c.bf16 %v1351_v9, %v1350_v8 }
 0x39e   : > { %2368 = vmatmul.mubr.bf16.vlgmr.msra.gmra.mrb[20].mxu0 %v1371_v10 }
 0x39f   : > { %2388 = vmatmul.mubr.bf16.vlgmr.msra.gmra.mrb[20].mxu1 %v1352_v11  ;;  %2392 = vmatpush3.bf16.msra.mxu0 %v2593_v6 }
 0x3a0   : > { %2407 = vmatprep.mubr.msk.bf16.mxu0 %vm2744_vm0, %v3032_v23  ;;  %2393 = vmatprep.subr.bf16.mxu0 %v3032_v23 }
 0x3a1   : > { %2427 = vmatprep.mubr.msk.bf16.mxu1 %vm2744_vm0, %v3032_v23  ;;  %2412 = vmatpush3.bf16.msra.mxu1 %v2601_v21 }
 0x3a2   : > { %2413 = vmatprep.subr.bf16.mxu1 %v3032_v23 }
 0x3a3   : > { %2394 = vmatpush3.bf16.msra.mxu0 %v2594_v13 }
 0x3a4   : > { %2395 = vmatprep.subr.bf16.mxu0 %v3032_v23 }
 0x3a5   : > { %2414 = vmatpush3.bf16.msra.mxu1 %v2602_v22 }
 0x3a6   : > { %2415 = vmatprep.subr.bf16.mxu1 %v3032_v23 }
 0x3a7   : > { %2396 = vmatpush3.bf16.msra.mxu0 %v2595_v15 }
 0x3a8   : > { %2397 = vmatprep.subr.bf16.mxu0 %v3032_v23 }
 0x3a9   : > { %2416 = vmatpush3.bf16.msra.mxu1 %v2603_v24 }
 0x3aa   : > { %2417 = vmatprep.subr.bf16.mxu1 %v3032_v23 }
 0x3ab   : > { %2398 = vmatpush3.bf16.msra.mxu0 %v2596_v16 }
 0x3ac   : > { %2399 = vmatprep.subr.bf16.mxu0 %v3032_v23 }
 0x3ad   : > { %2418 = vmatpush3.bf16.msra.mxu1 %v2604_v25 }
 0x3ae   : > { %2419 = vmatprep.subr.bf16.mxu1 %v3032_v23 }
 0x3af   : > { %2400 = vmatpush3.bf16.msra.mxu0 %v2597_v17 }
 0x3b0   : > { %2401 = vmatprep.subr.bf16.mxu0 %v3032_v23 }
 0x3b1   : > { %2420 = vmatpush3.bf16.msra.mxu1 %v2605_v26 }
 0x3b2   : > { %2421 = vmatprep.subr.bf16.mxu1 %v3032_v23 }
 0x3b3   : > { %2402 = vmatpush3.bf16.msra.mxu0 %v2598_v18 }
 0x3b4   : > { %2403 = vmatprep.subr.bf16.mxu0 %v3032_v23 }
 0x3b5   : > { %2422 = vmatpush3.bf16.msra.mxu1 %v2606_v27 }
 0x3b6   : > { %2423 = vmatprep.subr.bf16.mxu1 %v3032_v23 }
 0x3b7   : > { %2404 = vmatpush3.bf16.msra.mxu0 %v2599_v19 }
 0x3b8   : > { %2405 = vmatprep.subr.bf16.mxu0 %v3032_v23 }
 0x3b9   : > { %2424 = vmatpush3.bf16.msra.mxu1 %v2607_v28 }
 0x3ba   : > { %2425 = vmatprep.subr.bf16.mxu1 %v3032_v23 }
 0x3bb   : > { %2406 = vmatpush3.bf16.msra.mxu0 %v2600_v20 }
 0x3bd   : > { %2426 = vmatpush3.bf16.msra.mxu1 %v2608_v29 }
 0x3be   : > { %2408 = vmatmul.mubr.bf16.vlgmr.msra.gmra.mrb[24].mxu0 %v1568_v4 }
 0x471   : > { %v1470_v30 = vpop.f32.mrb[20].mxu0 }
 0x472   : > { %v1559_v31 = vpop.f32.mrb[20].mxu1  ;;  %v2369_v34 = vpop.f32.mrb[21].mxu0 }
 0x473   : > { %v1560_v32 = vadd.f32 %v1559_v31, %v1470_v30  ;;  %v2389_v35 = vpop.f32.mrb[21].mxu1  ;;  %v1473_v36 = vpop.f32.mrb[22].mxu0 }
 0x474   : > { %v1562_v33 = vpop.f32.mrb[22].mxu1  ;;  %v2370_v38 = vpop.f32.mrb[23].mxu0 }
 0x475   : > { %v1563_v37 = vadd.f32 %v1562_v33, %v1473_v36  ;;  %v2390_v39 = vpop.f32.mrb[23].mxu1 }
 0x491   : > { %v1667_v40 = vpop.f32.mrb[24].mxu0 }
 0x492   : > { %v1674_v42 = vadd.f32 %v1667_v40, %v1560_v32  ;;  %v2409_v43 = vpop.f32.mrb[25].mxu0 }
 0x493   : > { %v1670_v44 = vpop.f32.mrb[26].mxu0 }
 0x494   : > { %v1681_v23 = vadd.f32 %v2011_v41, %v1674_v42  ;;  %v1675_v45 = vadd.f32 %v1670_v44, %v1563_v37  ;;  %v2410_v46 = vpop.f32.mrb[27].mxu0 }
 0x496   : > { %v1683_v47 = vmax.f32 %v1681_v23, 0.0  ;;  %v1682_v48 = vadd.f32 %v2011_v41, %v1675_v45 }
 0x498   : > { %v1685_v49 = vadd.f32 %v1683_v47, %v3026_v12  ;;  %v1684_v50 = vmax.f32 %v1682_v48, 0.0 }
 0x49a   : > { %v1686_v51 = vadd.f32 %v1684_v50, %v3029_v14  ;;  %v1687_v52 = vmax.f32 %v1685_v49, 0.0 }
 0x49c   : > { %v1688_v53 = vmax.f32 %v1686_v51, 0.0 }
 0x49e   : > { %v1705_v54 = vpack.c.bf16 %v1688_v53, %v1687_v52 }
 0x4a0   : > { %2428 = vmatmul.mubr.bf16.vlgmr.msra.gmra.mrb[24].mxu1 %v1705_v54 }
 0x573   : > { %v1793_v56 = vpop.f32.mrb[24].mxu1 }
 0x574   : > { %v1794_v57 = vadd.f32 %v2012_v55, %v1793_v56  ;;  %v2429_v58 = vpop.f32.mrb[25].mxu1 }
 0x575   : > { %v1796_v12 = vpop.f32.mrb[26].mxu1 }
 0x576   : > { %1801 = vst.msk [vmem:[%s217_s9] sm:$0xff] %vm1800_vm1, %v1794_v57  ;;  %v1797_v59 = vadd.f32 %v2012_v55, %v1796_v12  ;;  %v2430_v14 = vpop.f32.mrb[27].mxu1 }
 0x578   : > { %1802 = vst.msk [vmem:[%s217_s9 + $0x8] sm:$0xff] %vm1800_vm1, %v1797_v59 }
 0x579 PF: > { %p14_p9 = scmp.ge.s32.totalorder %s2858_s27, 4   ;;  %s3119_s12 = smov %s2726_s13 }
 0x57a   : > { %s3120_s13 = smov %s2730_s14  ;;  %s3121_s14 = smov %s2869_s30 }
 0x57b   : > { %s3122_s15 = smov %s2858_s27  ;;  %16 = sbr.rel (!%p14_p9) target bundleno = 4 (0x4), region = 80 }
 0x582   :  { %1824 = vsyncpa [#allocation4], 1 }
 0x583   :  { %1826 = vsyncpa [#allocation4 + $0x1], 1 }
 0x584   :  { %1827 = vsyncpa [#allocation6], 1 }

</bundles_post_ra>
